<compile_context>
chip_gen: v7x
topology: tpu7x:2x2x1
jax: 0.10.0
libtpu: 0.0.40
codegen_flags: <defaults>
</compile_context>

<pallas_src>
import functools

import jax
import jax.numpy as jnp
from jax.experimental import pallas as pl
from jax.experimental.pallas import tpu as pltpu


def mlp_kernel(x_ref, w1_ref, b1_ref, w2_ref, b2_ref, o_ref, *, compute_dtype):
    # x_ref:  (TB, IN)   caller dtype (e.g. f32)
    # w1_ref: (IN, H)    compute_dtype (bf16)
    # b1_ref: (1, H)     f32
    # w2_ref: (H, OUT)   compute_dtype (bf16)
    # b2_ref: (1, OUT)   f32
    # o_ref:  (TB, OUT)  f32
    x = x_ref[...].astype(compute_dtype)  # in-register cast: MXU-native operands,
                                          # no extra HBM traffic for x.
    # fc1 (MXU, f32 accumulate) + bias + ReLU (VPU), all in VMEM/vregs.
    h = jnp.dot(x, w1_ref[...], preferred_element_type=jnp.float32)
    h = jnp.maximum(h + b1_ref[...], 0.0)
    # fc2 (MXU, f32 accumulate) + bias; hidden activation never touches HBM.
    h = h.astype(compute_dtype)
    out = jnp.dot(h, w2_ref[...], preferred_element_type=jnp.float32) + b2_ref[...]
    o_ref[...] = out.astype(o_ref.dtype)


def _round_up(n, m):
    return ((n + m - 1) // m) * m


@functools.partial(jax.jit, static_argnames=("block_b", "compute_dtype"))
def mlp_forward(x, w1, b1, w2, b2, *, block_b=2048, compute_dtype=jnp.bfloat16):
    """Fused MLP forward.

    x: (B, IN); w1: (IN, H); b1: (1, H) or (H,); w2: (H, OUT); b2: (1, OUT) or (OUT,).
    Returns (B, OUT) float32.
    """
    B, IN = x.shape
    H = w1.shape[1]
    OUT = w2.shape[1]

    # Weights in the MXU-native dtype (accuracy preserved by f32 accumulation);
    # biases stay f32 for the post-accumulation add.
    w1c = w1.astype(compute_dtype)
    w2c = w2.astype(compute_dtype)
    b1f = b1.reshape(1, H).astype(jnp.float32)
    b2f = b2.reshape(1, OUT).astype(jnp.float32)

    # Batch tile: multiple of 8 sublanes, >= 2 grid steps whenever B >= 16 so
    # v7x's second TensorCore gets work, capped at block_b rows per step.
    TB = min(_round_up(max((B + 1) // 2, 1), 8), block_b)
    grid = (pl.cdiv(B, TB),)

    return pl.pallas_call(
        functools.partial(mlp_kernel, compute_dtype=compute_dtype),
        out_shape=jax.ShapeDtypeStruct((B, OUT), jnp.float32),
        grid=grid,
        in_specs=[
            # Activations stream over the batch grid (full-extent feature dim,
            # no lane padding / no padded HBM copy).
            pl.BlockSpec((TB, IN), lambda i: (i, 0)),
            # Weights / biases: constant index_map -> stay VMEM-resident.
            pl.BlockSpec((IN, H), lambda i: (0, 0)),
            pl.BlockSpec((1, H), lambda i: (0, 0)),
            pl.BlockSpec((H, OUT), lambda i: (0, 0)),
            pl.BlockSpec((1, OUT), lambda i: (0, 0)),
        ],
        # Narrow (TB, OUT) writeback: masked store, but 12.8x less HBM traffic
        # than a 128-lane padded slab + wrapper slice.
        out_specs=pl.BlockSpec((TB, OUT), lambda i: (i, 0)),
        compiler_params=pltpu.CompilerParams(
            # Shards the batch grid across the two TensorCores on v7x.
            dimension_semantics=("parallel",),
        ),
    )(x, w1c, b1f, w2c, b2f)


def init_params(key, input_size=48, hidden_size=48, output_size=10):
    # Deterministic init mimicking nn.Linear's U(-1/sqrt(fan_in), 1/sqrt(fan_in)).
    k1, k2, k3, k4 = jax.random.split(key, 4)
    bound1 = 1.0 / jnp.sqrt(input_size)
    bound2 = 1.0 / jnp.sqrt(hidden_size)
    w1 = jax.random.uniform(k1, (input_size, hidden_size), jnp.float32, -bound1, bound1)
    b1 = jax.random.uniform(k2, (1, hidden_size), jnp.float32, -bound1, bound1)
    w2 = jax.random.uniform(k3, (hidden_size, output_size), jnp.float32, -bound2, bound2)
    b2 = jax.random.uniform(k4, (1, output_size), jnp.float32, -bound2, bound2)
    return w1, b1, w2, b2


if __name__ == "__main__":
    key = jax.random.PRNGKey(0)
    kx, kp = jax.random.split(key)

    batch, input_size, hidden_size, output_size = 8, 48, 48, 10
    x = jax.random.normal(kx, (batch, input_size), dtype=jnp.float32)
    w1, b1, w2, b2 = init_params(kp, input_size, hidden_size, output_size)

    out = mlp_forward(x, w1, b1, w2, b2)
    out = jax.block_until_ready(out)
    assert out.shape == (batch, output_size)

    # Reference with matched precision (bf16 operands, f32 accumulation).
    f32 = jnp.float32
    xb = x.astype(jnp.bfloat16).astype(f32)
    w1b = w1.astype(jnp.bfloat16).astype(f32)
    w2b = w2.astype(jnp.bfloat16).astype(f32)
    h_ref = jnp.maximum(xb @ w1b + b1.reshape(1, -1), 0.0)
    ref = h_ref.astype(jnp.bfloat16).astype(f32) @ w2b + b2.reshape(1, -1)
    assert jnp.allclose(out, ref, atol=2e-3, rtol=2e-3), float(jnp.max(jnp.abs(out - ref)))

    # Coarse sanity check against the pure-f32 PyTorch-equivalent math
    # (loose tolerance accounts for the bf16 operand rounding).
    ref_f32 = jnp.maximum(x @ w1 + b1.reshape(1, -1), 0.0) @ w2 + b2.reshape(1, -1)
    assert jnp.allclose(out, ref_f32, atol=1e-1, rtol=1e-1)

    print("KERNEL_OK")
</pallas_src>

<mosaic_0001>
module attributes {stable_mosaic.version = 11 : i64} {
  func.func @mlp_kernel(%arg0: i32, %arg1: memref<8x48xf32, #tpu.memory_space<vmem>>, %arg2: memref<48x48xbf16, #tpu.memory_space<vmem>>, %arg3: memref<1x48xf32, #tpu.memory_space<vmem>>, %arg4: memref<48x10xbf16, #tpu.memory_space<vmem>>, %arg5: memref<1x10xf32, #tpu.memory_space<vmem>>, %arg6: memref<8x10xf32, #tpu.memory_space<vmem>>) attributes {dimension_semantics = [#tpu.dimension_semantics<parallel>], iteration_bounds = array<i64: 1>, scalar_prefetch = 0 : i64, scratch_operands = 0 : i64, tpu.core_type = #tpu.core_type<tc>, window_params = [{transform_indices = @transform_0, window_bounds = array<i64: 8, 48>}, {pipeline_mode = #tpu.pipeline_mode<synchronous>, transform_indices = @transform_1, window_bounds = array<i64: 48, 48>}, {pipeline_mode = #tpu.pipeline_mode<synchronous>, transform_indices = @transform_2, window_bounds = array<i64: 1, 48>}, {pipeline_mode = #tpu.pipeline_mode<synchronous>, transform_indices = @transform_3, window_bounds = array<i64: 48, 10>}, {pipeline_mode = #tpu.pipeline_mode<synchronous>, transform_indices = @transform_4, window_bounds = array<i64: 1, 10>}, {transform_indices = @transform_5, window_bounds = array<i64: 8, 10>}]} {
    %c0 = arith.constant 0 : index
    %c0_0 = arith.constant 0 : index
    %0 = vector.load %arg1[%c0, %c0_0] : memref<8x48xf32, #tpu.memory_space<vmem>>, vector<8x48xf32>
    %1 = arith.truncf %0 : vector<8x48xf32> to vector<8x48xbf16>
    %c0_1 = arith.constant 0 : index
    %c0_2 = arith.constant 0 : index
    %2 = vector.load %arg2[%c0_1, %c0_2] : memref<48x48xbf16, #tpu.memory_space<vmem>>, vector<48x48xbf16>
    %cst = arith.constant dense<0.000000e+00> : vector<8x48xf32>
    %3 = tpu.matmul %1, %2, %cst {dimension_numbers = #tpu.dot_dimension_numbers<[1], [0], [0], [1], [0, 0, 1, 1], [], []>} : vector<8x48xbf16>, vector<48x48xbf16>, vector<8x48xf32> -> vector<8x48xf32>
    %c0_3 = arith.constant 0 : index
    %c0_4 = arith.constant 0 : index
    %4 = vector.load %arg3[%c0_3, %c0_4] : memref<1x48xf32, #tpu.memory_space<vmem>>, vector<1x48xf32>
    %5 = vector.broadcast %4 : vector<1x48xf32> to vector<8x48xf32>
    %6 = arith.addf %3, %5 : vector<8x48xf32>
    %cst_5 = arith.constant 0.000000e+00 : f32
    %7 = vector.broadcast %cst_5 : f32 to vector<8x48xf32>
    %8 = arith.maximumf %6, %7 : vector<8x48xf32>
    %9 = arith.truncf %8 : vector<8x48xf32> to vector<8x48xbf16>
    %c0_6 = arith.constant 0 : index
    %c0_7 = arith.constant 0 : index
    %10 = vector.load %arg4[%c0_6, %c0_7] : memref<48x10xbf16, #tpu.memory_space<vmem>>, vector<48x10xbf16>
    %cst_8 = arith.constant dense<0.000000e+00> : vector<8x10xf32>
    %11 = tpu.matmul %9, %10, %cst_8 {dimension_numbers = #tpu.dot_dimension_numbers<[1], [0], [0], [1], [0, 0, 1, 1], [], []>} : vector<8x48xbf16>, vector<48x10xbf16>, vector<8x10xf32> -> vector<8x10xf32>
    %c0_9 = arith.constant 0 : index
    %c0_10 = arith.constant 0 : index
    %12 = vector.load %arg5[%c0_9, %c0_10] : memref<1x10xf32, #tpu.memory_space<vmem>>, vector<1x10xf32>
    %13 = vector.broadcast %12 : vector<1x10xf32> to vector<8x10xf32>
    %14 = arith.addf %11, %13 : vector<8x10xf32>
    %c0_11 = arith.constant 0 : index
    %c0_12 = arith.constant 0 : index
    %15 = vector.load %arg6[%c0_11, %c0_12] : memref<8x10xf32, #tpu.memory_space<vmem>>, vector<8x10xf32>
    tpu.vector_store %arg6[%c0_11, %c0_12], %14 {strides = array<i32>} : memref<8x10xf32, #tpu.memory_space<vmem>>, vector<8x10xf32>,
    return
  }
  func.func @transform_0(%arg0: i32) -> (i32, i32) {
    %c0_i32 = arith.constant 0 : i32
    %c0_i32_0 = arith.constant 0 : i32
    return %arg0, %c0_i32 : i32, i32
  }
  func.func @transform_1(%arg0: i32) -> (i32, i32) {
    %c0_i32 = arith.constant 0 : i32
    %c0_i32_0 = arith.constant 0 : i32
    %c0_i32_1 = arith.constant 0 : i32
    return %c0_i32, %c0_i32_0 : i32, i32
  }
  func.func @transform_2(%arg0: i32) -> (i32, i32) {
    %c0_i32 = arith.constant 0 : i32
    %c0_i32_0 = arith.constant 0 : i32
    %c0_i32_1 = arith.constant 0 : i32
    return %c0_i32, %c0_i32_0 : i32, i32
  }
  func.func @transform_3(%arg0: i32) -> (i32, i32) {
    %c0_i32 = arith.constant 0 : i32
    %c0_i32_0 = arith.constant 0 : i32
    %c0_i32_1 = arith.constant 0 : i32
    return %c0_i32, %c0_i32_0 : i32, i32
  }
  func.func @transform_4(%arg0: i32) -> (i32, i32) {
    %c0_i32 = arith.constant 0 : i32
    %c0_i32_0 = arith.constant 0 : i32
    %c0_i32_1 = arith.constant 0 : i32
    return %c0_i32, %c0_i32_0 : i32, i32
  }
  func.func @transform_5(%arg0: i32) -> (i32, i32) {
    %c0_i32 = arith.constant 0 : i32
    %c0_i32_0 = arith.constant 0 : i32
    return %arg0, %c0_i32 : i32, i32
  }
}

</mosaic_0001>

<bundles_post_ra>
// kernel: mlp_forward.1
= control target key start
LH: loop header
LB: loop body
LE: loop exit
PB: predicated region body
PF: predicated region fallthrough
CT: control target
= control target key end

     0   :  { %v262_v1 = vmov 0.0   ;;  %vm263_vm0 = vmmov 0   ;;  %s334_s0 = inlined_call_operand.vmem [shape: f32[8,48], index: 0, kind: input, shape index: {}]   ;;  %s335_s1 = inlined_call_operand.vmem [shape: bf16[48,48], index: 1, kind: input, shape index: {}]   ;;  %s336_s2 = inlined_call_operand.vmem [shape: f32[1,48], index: 2, kind: input, shape index: {}]   ;;  %s337_s3 = inlined_call_operand.vmem [shape: bf16[48,10], index: 3, kind: input, shape index: {}]   ;;  %s338_s4 = inlined_call_operand.vmem [shape: f32[1,10], index: 4, kind: input, shape index: {}]   ;;  %s339_s5 = inlined_call_operand.hbm [shape: f32[8,10], index: 5, kind: output, shape index: {}]  }
   0x1   :  { %v232_v0 = vld [vmem:[%s335_s1] sm:$0xff]   ;;  %209 = vmatprep.subr.bf16.mxu0 %v262_v1  ;;  %219 = vmatprep.subr.bf16.mxu1 %v262_v1  ;;  %v233_v2 = vld [vmem:[%s335_s1 + $0x8] sm:$0xff]   ;;  %v234_v4 = vld [vmem:[%s335_s1 + $0x10] sm:$0xff]  }
   0x2   :  { %210 = vmatpush3.bf16.msra.mxu0 %v232_v0  ;;  %215 = vmatprep.mubr.msk.bf16.mxu0 %vm263_vm0, %v262_v1  ;;  %v235_v3 = vld [vmem:[%s337_s3] sm:$0xff]  }
   0x3   :  { %211 = vmatprep.subr.bf16.mxu0 %v262_v1  ;;  %225 = vmatprep.mubr.msk.bf16.mxu1 %vm263_vm0, %v262_v1  ;;  %v22_v5 = vld [vmem:[%s334_s0] sm:$0xff] }
   0x4   :  { %220 = vmatpush3.bf16.msra.mxu1 %v235_v3 }
   0x6   :  { %212 = vmatpush3.bf16.msra.mxu0 %v233_v2 }
   0x7   :  { %10 = vsyncpa [#allocation3], 0  ;;  %213 = vmatprep.subr.bf16.mxu0 %v262_v1  ;;  %221 = vmatprep.subr.bf16.mxu1 %v262_v1  ;;  %v23_v6 = vpack.c.bf16 %v22_v5, %v22_v5  ;;  %vm55_vm1 = vcmask 392192   ;;  %v236_v7 = vld [vmem:[%s337_s3 + $0x8] sm:$0xff]   ;;  %v237_v8 = vld [vmem:[%s337_s3 + $0x10] sm:$0xff]   ;;  %s264_s9 = smov [#allocation2]  }
   0x8   :  { %222 = vmatpush3.bf16.msra.mxu1 %v236_v7  ;;  %v191_v9 = vld [vmem:[%s336_s2] ss:$0 sm:$0xff]  ;;  %s183_s10 = sshll.u32 %s264_s9, 4  ;;  %vm175_vm2 = vcmask 80896   ;;  %s184_s10 = int_to_ptr.vmem [resolvable:$true] %s183_s10 }
   0x9   :  { %223 = vmatprep.subr.bf16.mxu1 %v262_v1  ;;  %v196_v17 = vld [vmem:[%s338_s4] ss:$0 sm:$0xff]  ;;  %s238_s2 = scalar_lea.vmem %s184_s10, 128  ;;  %p243_p1 = scmp.lt.s32.totalorder %s184_s10, %s184_s10 }
   0xa   :  { %214 = vmatpush3.bf16.msra.mxu0 %v234_v4  ;;  %p239_p0 = scmp.ne.s32.totalorder %s184_s10, %s238_s2  ;;  %p244_p2 = scmp.lt.s32.totalorder %s238_s2, %s238_s2 }
   0xc   :  { %224 = vmatpush3.bf16.msra.mxu1 %v237_v8  ;;  %p245_p3 = por %p244_p2, %p243_p1 }
   0xd   :  { %216 = vmatmul.mubr.msk.bf16.vlgmr.msra.gmra.mrb[0].mxu0 %vm55_vm1, %v23_v6 }
   0xe   :  { %p246_p4 = pnand %p245_p3, %p239_p0 }
  0xe0   :  { %v93_v10 = vpop.f32.mrb[0].mxu0 }
  0xe1   :  { %v94_v11 = vadd.f32 %v191_v9, %v93_v10  ;;  %v217_v12 = vpop.f32.mrb[1].mxu0 }
  0xe2   :  { %v96_v13 = vpop.f32.mrb[2].mxu0 }
  0xe3   :  { %v99_v14 = vmax.f32 %v94_v11, 0.0  ;;  %v218_v15 = vpop.f32.mrb[3].mxu0 }
  0xe5   :  { %v100_v16 = vpack.c.bf16 %v99_v14, %v99_v14 }
  0xe7   :  { %226 = vmatmul.mubr.msk.bf16.vlgmr.msra.gmra.mrb[0].mxu1 %vm55_vm1, %v100_v16 }
 0x1ba   :  { %v169_v18 = vpop.f32.mrb[0].mxu1 }
 0x1bb   :  { %v170_v19 = vadd.f32 %v196_v17, %v169_v18  ;;  %v227_v20 = vpop.f32.mrb[1].mxu1 }
 0x1bc   :  { %v172_v21 = vpop.f32.mrb[2].mxu1 }
 0x1bd   :  { %v228_v22 = vpop.f32.mrb[3].mxu1  ;;  %176 = vst.msk [vmem:[#allocation2] sm:$0xff] %vm175_vm2, %v170_v19 }
 0x1be   :  { %249 = shalt.err (!%p246_p4)
}
 0x1bf   :  { %s250_s4 = scalar_lea.hbm %s339_s5, 128 }
 0x1c0   :  { %p251_p5 = scmp.ne.s32.totalorder %s339_s5, %s250_s4  ;;  %p254_p6 = scmp.lt.u32.totalorder %s250_s4, %s339_s5 }
 0x1c2   :  { %p256_p7 = pnand %p254_p6, %p251_p5 }
 0x1c4   :  { %259 = shalt.err (!%p256_p7)
}
 0x1c5   :  { %186 = dma.vmem_to_hbm [thread:$0]  %s184_s10, 128, %s339_s5, [#allocation3]  }
 0x1c6   :  { %260 = dma.done.wait [#allocation3], 128  }
 0x1c7   :  { %261 = vsyncadd [#allocation3], 4294967168 }
 0x1c8   :  { %190 = vsyncpa [#allocation3], 1 }

</bundles_post_ra>
